<compile_context>
chip_gen: v5e
topology: v5e:2x2
jax: 0.10.0
libtpu: 0.0.40
codegen_flags: <defaults>
</compile_context>

<pallas_src>
import functools

import jax
import jax.numpy as jnp
from jax.experimental import pallas as pl
from jax.experimental.pallas import tpu as pltpu

EPS = 1e-5
TILE_TOKENS = 512                     # target tokens per grid step
VOCAB_BLOCK = 1024                    # vocab rows streamed per reduction step (large-V path)
VOCAB_SUBCHUNK = 512                  # one-hot compare/dot sub-chunk width
FAST_TABLE_BYTES = 8 * 1024 * 1024    # keep table VMEM-resident below this size
VMEM_LIMIT_BYTES = 48 * 1024 * 1024   # explicit scoped-VMEM budget (fits v7x's 64 MiB)


def _round_up(x, m):
    return ((x + m - 1) // m) * m


def _cdiv(a, b):
    return (a + b - 1) // b


def _vocab_chunks(vocab_rows):
    """Static (start, size) sub-chunks covering [0, vocab_rows)."""
    chunks, start = [], 0
    while start < vocab_rows:
        size = min(VOCAB_SUBCHUNK, vocab_rows - start)
        chunks.append((start, size))
        start += size
    return chunks


def _onehot_gather(ids, table_ref, base_offset):
    """(T,1) ids -> (T, D) f32 rows of table_ref, via chunked one-hot @ table on MXU."""
    t = ids.shape[0]
    acc = None
    for start, size in _vocab_chunks(table_ref.shape[0]):
        col = jax.lax.broadcasted_iota(jnp.int32, (t, size), 1)
        # Offset goes on ids (T elements) instead of the (T, size) iota.
        onehot = ((ids - (base_offset + start)) == col).astype(table_ref.dtype)
        part = jnp.dot(onehot, table_ref[start:start + size, :],
                       preferred_element_type=jnp.float32)
        acc = part if acc is None else acc + part
    return acc


def _layernorm(x, gamma, beta):
    mean = jnp.mean(x, axis=-1, keepdims=True)
    centered = x - mean
    var = jnp.mean(centered * centered, axis=-1, keepdims=True)
    return centered * jax.lax.rsqrt(var + EPS) * gamma + beta


def _gene_encoder_fast_kernel(ids_ref, table_ref, gamma_ref, beta_ref, out_ref):
    # ids (T,1) i32 | table (V,D) resident | gamma/beta (1,D) | out (T,D)
    x = _onehot_gather(ids_ref[...], table_ref, 0)
    y = _layernorm(x,
                   gamma_ref[...].astype(jnp.float32),
                   beta_ref[...].astype(jnp.float32))
    out_ref[...] = y.astype(out_ref.dtype)


def _gene_encoder_stream_kernel(ids_ref, table_ref, gamma_ref, beta_ref, out_ref,
                                *, vocab_block):
    # Large-vocab path: vocab streamed in (Vb, D) blocks along grid axis 1;
    # the output block is resident across axis 1 and doubles as the accumulator.
    j = pl.program_id(1)

    part = _onehot_gather(ids_ref[...], table_ref, j * vocab_block)  # (T, D) f32

    @pl.when(j == 0)
    def _():
        out_ref[...] = part.astype(out_ref.dtype)

    @pl.when(j > 0)
    def _():
        # Exact even in low precision: each token's row is nonzero in exactly one block.
        out_ref[...] = (out_ref[...].astype(jnp.float32) + part).astype(out_ref.dtype)

    @pl.when(j == pl.num_programs(1) - 1)
    def _():
        y = _layernorm(out_ref[...].astype(jnp.float32),
                       gamma_ref[...].astype(jnp.float32),
                       beta_ref[...].astype(jnp.float32))
        out_ref[...] = y.astype(out_ref.dtype)


def gene_encoder_forward(token_ids, emb_table, gamma, beta, *, tile_tokens=TILE_TOKENS):
    """token_ids: (B,S) int; emb_table: (V,D); gamma/beta: (D,). Returns (B,S,D)."""
    B, S = token_ids.shape
    V, D = emb_table.shape
    N = B * S
    out_dtype = emb_table.dtype
    itemsize = jnp.dtype(emb_table.dtype).itemsize

    small_vocab = V * D * itemsize <= FAST_TABLE_BYTES

    # Balanced token tiling: minimizes tail padding for N slightly above a tile multiple.
    num_tiles = max(1, _cdiv(N, tile_tokens))
    if small_vocab and num_tiles == 1 and N >= 16:
        num_tiles = 2  # give both v7x TensorCores work; negligible cost elsewhere
    T = _round_up(_cdiv(N, num_tiles), 8)
    N_pad = num_tiles * T

    ids = token_ids.reshape(N).astype(jnp.int32)
    if N_pad != N:
        ids = jnp.pad(ids, (0, N_pad - N))        # padded rows are sliced off below
    ids_col = ids.reshape(N_pad, 1)

    gamma2d = gamma.reshape(1, D)
    beta2d = beta.reshape(1, D)

    if small_vocab:
        # Table is a single resident block (constant index_map -> fetched once).
        grid = (num_tiles,)
        in_specs = [
            pl.BlockSpec((T, 1), lambda i: (i, 0)),
            pl.BlockSpec((V, D), lambda i: (0, 0)),
            pl.BlockSpec((1, D), lambda i: (0, 0)),
            pl.BlockSpec((1, D), lambda i: (0, 0)),
        ]
        out_specs = pl.BlockSpec((T, D), lambda i: (i, 0))
        kernel = _gene_encoder_fast_kernel
        dim_sem = ("parallel",)
        table = emb_table
    else:
        Vb = min(VOCAB_BLOCK, _round_up(V, 8))
        V_pad = _round_up(V, Vb)
        table = emb_table
        if V_pad != V:
            # Zero rows are never selected; padded ids (id 0) only affect sliced-off rows.
            table = jnp.pad(table, ((0, V_pad - V), (0, 0)))
        num_vblk = V_pad // Vb
        grid = (num_tiles, num_vblk)
        in_specs = [
            pl.BlockSpec((T, 1), lambda i, j: (i, 0)),
            pl.BlockSpec((Vb, D), lambda i, j: (j, 0)),
            pl.BlockSpec((1, D), lambda i, j: (0, 0)),
            pl.BlockSpec((1, D), lambda i, j: (0, 0)),
        ]
        out_specs = pl.BlockSpec((T, D), lambda i, j: (i, 0))
        kernel = functools.partial(_gene_encoder_stream_kernel, vocab_block=Vb)
        dim_sem = ("parallel", "arbitrary")

    out_flat = pl.pallas_call(
        kernel,
        out_shape=jax.ShapeDtypeStruct((N_pad, D), out_dtype),
        grid=grid,
        in_specs=in_specs,
        out_specs=out_specs,
        compiler_params=pltpu.CompilerParams(
            dimension_semantics=dim_sem,
            vmem_limit_bytes=VMEM_LIMIT_BYTES),
    )(ids_col, table, gamma2d, beta2d)

    return out_flat[:N].reshape(B, S, D)


def gene_encoder_reference(token_ids, emb_table, gamma, beta):
    """Pure-JAX reference matching PyTorch nn.Embedding + nn.LayerNorm semantics."""
    x = jnp.take(emb_table, token_ids, axis=0)                    # (B, S, D)
    mean = jnp.mean(x, axis=-1, keepdims=True)
    var = jnp.mean((x - mean) ** 2, axis=-1, keepdims=True)
    return (x - mean) * jax.lax.rsqrt(var + EPS) * gamma + beta


if __name__ == "__main__":
    key = jax.random.PRNGKey(0)
    k_emb, k_ids = jax.random.split(key)

    # Module hyperparameters (small, consistent with GeneEncoder.__init__).
    num_embeddings = 64     # vocabulary of gene tokens
    embedding_dim = 32
    padding_idx = 0
    B, S = 2, 8

    # Deterministic parameter init (nn.Embedding ~ N(0,1), LayerNorm gamma=1, beta=0).
    emb_table = jax.random.normal(k_emb, (num_embeddings, embedding_dim), dtype=jnp.float32)
    emb_table = emb_table.at[padding_idx].set(0.0)  # padding_idx row zeroed, as in nn.Embedding
    gamma = jnp.ones((embedding_dim,), dtype=jnp.float32)
    beta = jnp.zeros((embedding_dim,), dtype=jnp.float32)

    # Deterministic token ids (include the padding index to exercise that path).
    token_ids = jax.random.randint(k_ids, (B, S), 0, num_embeddings, dtype=jnp.int32)
    token_ids = token_ids.at[0, 0].set(padding_idx)

    out = gene_encoder_forward(token_ids, emb_table, gamma, beta)
    out = jax.block_until_ready(out)

    ref = gene_encoder_reference(token_ids, emb_table, gamma, beta)
    assert out.shape == (B, S, embedding_dim)
    assert jnp.allclose(out, ref, atol=1e-5, rtol=1e-5), "mismatch vs reference"

    print("KERNEL_OK")
</pallas_src>

<mosaic_0001>
module attributes {stable_mosaic.version = 11 : i64} {
  func.func @_gene_encoder_fast_kernel(%arg0: i32, %arg1: memref<8x1xi32, #tpu.memory_space<vmem>>, %arg2: memref<64x32xf32, #tpu.memory_space<vmem>>, %arg3: memref<1x32xf32, #tpu.memory_space<vmem>>, %arg4: memref<1x32xf32, #tpu.memory_space<vmem>>, %arg5: memref<8x32xf32, #tpu.memory_space<vmem>>) attributes {dimension_semantics = [#tpu.dimension_semantics<parallel>], iteration_bounds = array<i64: 2>, scalar_prefetch = 0 : i64, scratch_operands = 0 : i64, tpu.core_type = #tpu.core_type<tc>, window_params = [{transform_indices = @transform_0, window_bounds = array<i64: 8, 1>}, {pipeline_mode = #tpu.pipeline_mode<synchronous>, transform_indices = @transform_1, window_bounds = array<i64: 64, 32>}, {pipeline_mode = #tpu.pipeline_mode<synchronous>, transform_indices = @transform_2, window_bounds = array<i64: 1, 32>}, {pipeline_mode = #tpu.pipeline_mode<synchronous>, transform_indices = @transform_3, window_bounds = array<i64: 1, 32>}, {transform_indices = @transform_4, window_bounds = array<i64: 8, 32>}]} {
    %c0 = arith.constant 0 : index
    %c0_0 = arith.constant 0 : index
    %0 = vector.load %arg1[%c0, %c0_0] : memref<8x1xi32, #tpu.memory_space<vmem>>, vector<8x1xi32>
    %1 = tpu.iota {dimensions = array<i32: 1>} : vector<8x64xi32>
    %c0_i32 = arith.constant 0 : i32
    %2 = vector.broadcast %c0_i32 : i32 to vector<8x1xi32>
    %3 = arith.subi %0, %2 : vector<8x1xi32>
    %4 = vector.broadcast %3 : vector<8x1xi32> to vector<8x64xi32>
    %5 = arith.cmpi eq, %4, %1 : vector<8x64xi32>
    %6 = arith.extui %5 : vector<8x64xi1> to vector<8x64xi32>
    %7 = arith.sitofp %6 : vector<8x64xi32> to vector<8x64xf32>
    %c0_1 = arith.constant 0 : index
    %c0_2 = arith.constant 0 : index
    %8 = vector.load %arg2[%c0_1, %c0_2] : memref<64x32xf32, #tpu.memory_space<vmem>>, vector<64x32xf32>
    %cst = arith.constant dense<0.000000e+00> : vector<8x32xf32>
    %9 = tpu.matmul %7, %8, %cst {dimension_numbers = #tpu.dot_dimension_numbers<[1], [0], [0], [1], [0, 0, 1, 1], [], []>} : vector<8x64xf32>, vector<64x32xf32>, vector<8x32xf32> -> vector<8x32xf32>
    %c0_3 = arith.constant 0 : index
    %c0_4 = arith.constant 0 : index
    %10 = vector.load %arg3[%c0_3, %c0_4] : memref<1x32xf32, #tpu.memory_space<vmem>>, vector<1x32xf32>
    %c0_5 = arith.constant 0 : index
    %c0_6 = arith.constant 0 : index
    %11 = vector.load %arg4[%c0_5, %c0_6] : memref<1x32xf32, #tpu.memory_space<vmem>>, vector<1x32xf32>
    %cst_7 = arith.constant dense<0.000000e+00> : vector<8xf32>
    %12 = vector.multi_reduction <add>, %9, %cst_7 [1] : vector<8x32xf32> to vector<8xf32>
    %13 = vector.shape_cast %12 : vector<8xf32> to vector<8x1xf32>
    %cst_8 = arith.constant 3.200000e+01 : f32
    %14 = vector.broadcast %cst_8 : f32 to vector<8x1xf32>
    %15 = arith.divf %13, %14 : vector<8x1xf32>
    %16 = vector.broadcast %15 : vector<8x1xf32> to vector<8x32xf32>
    %17 = arith.subf %9, %16 : vector<8x32xf32>
    %18 = arith.mulf %17, %17 : vector<8x32xf32>
    %cst_9 = arith.constant dense<0.000000e+00> : vector<8xf32>
    %19 = vector.multi_reduction <add>, %18, %cst_9 [1] : vector<8x32xf32> to vector<8xf32>
    %20 = vector.shape_cast %19 : vector<8xf32> to vector<8x1xf32>
    %cst_10 = arith.constant 3.200000e+01 : f32
    %21 = vector.broadcast %cst_10 : f32 to vector<8x1xf32>
    %22 = arith.divf %20, %21 : vector<8x1xf32>
    %cst_11 = arith.constant 9.99999974E-6 : f32
    %23 = vector.broadcast %cst_11 : f32 to vector<8x1xf32>
    %24 = arith.addf %22, %23 : vector<8x1xf32>
    %25 = math.rsqrt %24 : vector<8x1xf32>
    %26 = vector.broadcast %25 : vector<8x1xf32> to vector<8x32xf32>
    %27 = arith.mulf %17, %26 : vector<8x32xf32>
    %28 = vector.broadcast %10 : vector<1x32xf32> to vector<8x32xf32>
    %29 = arith.mulf %27, %28 : vector<8x32xf32>
    %30 = vector.broadcast %11 : vector<1x32xf32> to vector<8x32xf32>
    %31 = arith.addf %29, %30 : vector<8x32xf32>
    %c0_12 = arith.constant 0 : index
    %c0_13 = arith.constant 0 : index
    %32 = vector.load %arg5[%c0_12, %c0_13] : memref<8x32xf32, #tpu.memory_space<vmem>>, vector<8x32xf32>
    tpu.vector_store %arg5[%c0_12, %c0_13], %31 {strides = array<i32>} : memref<8x32xf32, #tpu.memory_space<vmem>>, vector<8x32xf32>,
    return
  }
  func.func @transform_0(%arg0: i32) -> (i32, i32) {
    %c0_i32 = arith.constant 0 : i32
    %c0_i32_0 = arith.constant 0 : i32
    return %arg0, %c0_i32 : i32, i32
  }
  func.func @transform_1(%arg0: i32) -> (i32, i32) {
    %c0_i32 = arith.constant 0 : i32
    %c0_i32_0 = arith.constant 0 : i32
    %c0_i32_1 = arith.constant 0 : i32
    return %c0_i32, %c0_i32_0 : i32, i32
  }
  func.func @transform_2(%arg0: i32) -> (i32, i32) {
    %c0_i32 = arith.constant 0 : i32
    %c0_i32_0 = arith.constant 0 : i32
    %c0_i32_1 = arith.constant 0 : i32
    return %c0_i32, %c0_i32_0 : i32, i32
  }
  func.func @transform_3(%arg0: i32) -> (i32, i32) {
    %c0_i32 = arith.constant 0 : i32
    %c0_i32_0 = arith.constant 0 : i32
    %c0_i32_1 = arith.constant 0 : i32
    return %c0_i32, %c0_i32_0 : i32, i32
  }
  func.func @transform_4(%arg0: i32) -> (i32, i32) {
    %c0_i32 = arith.constant 0 : i32
    %c0_i32_0 = arith.constant 0 : i32
    return %arg0, %c0_i32 : i32, i32
  }
}

</mosaic_0001>

<bundles_post_ra>
// kernel: tpu_custom_call.1
= control target key start
LH: loop header
LB: loop body
LE: loop exit
PB: predicated region body
PF: predicated region fallthrough
CT: control target
= control target key end

     0   :  { %9 = vsyncpa [#allocation3], 0  ;;  %s621_s0 = inlined_call_operand.vmem [shape: s32[16,1], index: 0, kind: input, shape index: {}]   ;;  %s622_s1 = inlined_call_operand.vmem [shape: f32[64,32], index: 1, kind: input, shape index: {}]   ;;  %s623_s2 = inlined_call_operand.vmem [shape: f32[1,32], index: 2, kind: input, shape index: {}]   ;;  %s624_s3 = inlined_call_operand.vmem [shape: f32[1,32], index: 3, kind: input, shape index: {}]   ;;  %s625_s4 = inlined_call_operand.hbm [shape: f32[16,32], index: 4, kind: output, shape index: {}]  }
   0x1   :  { %11 = vsyncpa [#allocation3 + $0x1], 0  ;;  %s503_s15 = smov 0   ;;  %s505_s16 = smov 0  }
   0x2   :  { %s507_s17 = smov 0   ;;  %s509_s18 = smov 0  }
   0x3 LB: > { %s524_s19 = sadd.s32 4294967295, %s473_s18   ;;  %s350_s20 = sadd.s32 4294967294, %s473_s18   ;;  %s473_s18 = sphi %s509_s18, %s631_s18   ;;  %s469_s17 = sphi %s507_s17, %s630_s17   ;;  %s465_s16 = sphi %s505_s16, %s629_s16   ;;  %s461_s15 = sphi %s503_s15, %s628_s15  }
   0x4   : > { %s528_s21 = sadd.s32 1, %s473_s18   ;;  %s113_s22 = sadd.s32 1, %s469_s17 }
   0x5   : > { %s110_s23 = ssub.s32 %s473_s18, %s528_s21  ;;  %p123_p0 = scmp.ne.s32.totalorder %s469_s17, %s465_s16 }
   0x6   : > { %p111_p1 = scmp.eq.s32.totalorder %s110_s23, 0  ;;  %p124_p2 = scmp.eq.s32.totalorder %s524_s19, 1 }
   0x7   : > { %p129_p3 = scmp.ne.s32.totalorder %s465_s16, %s461_s15  ;;  %p130_p4 = scmp.eq.s32.totalorder %s350_s20, 1 }
   0x8   : > { %s539_s24 = scalar_select %p111_p1, %s469_s17, %s113_s22  }
   0x9   : > { %p541_p5 = por %p124_p2, %p123_p0  ;;  %p545_p6 = por %p130_p4, %p129_p3 }
   0xa   : > { %p353_p7 = scmp.ge.s32.totalorder %s473_s18, 1  ;;  %p164_p8 = scmp.lt.s32.totalorder %s473_s18, 3 }
   0xc   : > { %p165_p9 = pnand %p353_p7, %p164_p8 }
   0xd   : > { %p189_p10 = scmp.lt.s32.totalorder (!%p165_p9), %s524_s19, 1  ;;  %s359_s7 = sshll.u32 (!%p165_p9), %s524_s19, 3 }
   0xe   : > { %168 = sbr.rel (%p165_p9) target bundleno = 538 (0x21a), region = 36  ;;  %s286_s12 = scalar_lea.hbm (!%p165_p9), %s625_s4, %s359_s7 }
   0xf   : > { %s290_s22 = sshll.u32 (!%p165_p9), %s286_s12, 4  ;;  %s291_s22 = int_to_ptr.hbm [resolvable:$true] %s290_s22 }
  0x10   : > { %s425_s27 = sshra.s32 (!%p165_p9), %s291_s22, 4  ;;  %s426_s27 = int_to_ptr.hbm [resolvable:$true] %s425_s27 }
  0x11   : > { %s427_s28 = scalar_lea.hbm (!%p165_p9), %s426_s27, 8  ;;  %p432_p0 = scmp.lt.s32.totalorder (!%p165_p9), %s426_s27, %s625_s4 }
  0x12   : > { %p428_p11 = scmp.ne.s32.totalorder (!%p165_p9), %s426_s27, %s427_s28 }
  0x13   : > { %v209_v0 = vld [vmem:[%s622_s1 + $0x38] sm:$0xff]  ;;  %v208_v1 = vld [vmem:[%s622_s1 + $0x30] sm:$0xff]  ;;  %v475_v2 = vmov 0   ;;  %s190_s5 = scalar_select %p189_p10, %s524_s19, 1  ;;  %v207_v3 = vld [vmem:[%s622_s1 + $0x28] sm:$0xff]  ;;  %v194_v10 = vlaneseq  ;;  %vm210_vm0 = vcmask 523264  }
  0x14   : > { %404 = vset.pattern.permute.xlu0 %v475_v2  ;;  %222 = vmatpush.msra.mxu0 %v209_v0  ;;  %v206_v4 = vld [vmem:[%s622_s1 + $0x20] sm:$0xff]  ;;  %v205_v6 = vld [vmem:[%s622_s1 + $0x18] sm:$0xff]  ;;  %v204_v7 = vld [vmem:[%s622_s1 + $0x10] sm:$0xff]  ;;  %v476_v13 = vmov 0.0   ;;  %vm236_vm2 = vcmask 261120   ;;  %v477_v17 = vmov 32.0   ;;  %p429_p12 = pnand %p428_p11, %p541_p5 }
  0x15   : > { %s355_s8 = sshll.u32 %s190_s5, 3  ;;  %v203_v8 = vld [vmem:[%s622_s1 + $0x8] sm:$0xff]  ;;  %v202_v9 = vld [vmem:[%s622_s1] sm:$0xff]  ;;  %v195_v11 = vand.u32 127, %v194_v10  ;;  %407 = vrcp.f32 %v477_v17  ;;  %s186_s5 = sand.u32 1, %s465_s16  }
  0x16   : > { %223 = vmatpush.msra.mxu0 %v208_v1  ;;  %s192_s13 = scalar_lea.vmem %s621_s0, %s355_s8  ;;  %s354_s6 = sshll.u32 %s186_s5, 3  ;;  %v405_v38 = vld [vmem:[%s623_s2] ss:$0 sm:$0xff] }
  0x17   : > { %v193_v5 = vld [vmem:[%s192_s13] sm:$0xff]  ;;  %s188_s20 = scalar_lea.vmem [#allocation2], %s354_s6  ;;  %s276_s23 = scalar_lea.sflag [#allocation3], %s186_s5 }
  0x18   : > { %224 = vmatpush.msra.mxu0 %v207_v3  ;;  %197 = vperm.xlu0 %404, %v193_v5   ;;  %v406_v41 = vld [vmem:[%s624_s3] ss:$0 sm:$0xff]  ;;  %s288_s19 = sshll.u32 %s188_s20, 4  ;;  %p430_p13 = pneg %p429_p12  ;;  %s289_s19 = int_to_ptr.vmem [resolvable:$true] %s288_s19 }
  0x19   : > { %s431_s6 = scalar_lea.hbm %s625_s4, 16 }
  0x1a   : > { %225 = vmatpush.msra.mxu0 %v206_v4  ;;  %p433_p1 = scmp.lt.s32.totalorder %s431_s6, %s427_s28 }
  0x1b   : > { %v408_v18 = vpop.eup %407 }
  0x1c   : > { %226 = vmatpush.msra.mxu0 %v205_v6  ;;  %v241_v19 = vmul.f32 32.0, %v408_v18  ;;  %vm245_vm3 = vweird.f32 %v408_v18  ;;  %p434_p2 = por %p433_p1, %p432_p0 }
  0x1e   : > { %227 = vmatpush.msra.mxu0 %v204_v7  ;;  %v242_v20 = vsub.f32 1.0, %v241_v19  ;;  %p435_p3 = pnand %p434_p2, %p430_p13 }
  0x20   : > { %228 = vmatpush.msra.mxu0 %v203_v8  ;;  %v243_v21 = vmul.f32 %v408_v18, %v242_v20 }
  0x22   : > { %229 = vmatpush.msra.mxu0 %v202_v9  ;;  %v244_v22 = vadd.f32 %v408_v18, %v243_v21 }
  0x24   : > { %v246_v23 = vsel %vm245_vm3, %v408_v18, %v244_v22 }
  0x8a   : > { %v198_v12 = vpop.permute.xlu0 %197 }
  0x8b   : > { %vm199_vm1 = vcmp.eq.s32.totalorder %v198_v12, %v195_v11 }
  0x8c   : > { %v356_v14 = vsel %vm199_vm1, 1.0, %v476_v13 }
  0x8d   : > { %357 = vmatmul.msk.f32.vlgmr.msra.gmra.mxu0 %vm210_vm0, %v356_v14 }
 0x10a   : > { %v231_v15 = vpop.f32.mrf.mxu0 }
 0x10b   : > { %v237_v16 = vsel %vm236_vm2, %v231_v15, 0.0 }
 0x10c   : > { %238 = vadd.xlane.f32.xlu0 %v237_v16 }
 0x17f   : > { %v239_v24 = vpop.xlane.xlu0 %238 }
 0x180   : > { %v247_v25 = vmul.f32 %v246_v23, %v239_v24 }
 0x182   : > { %v248_v26 = vsub.f32 %v231_v15, %v247_v25 }
 0x184   : > { %v249_v27 = vmul.f32 %v248_v26, %v248_v26 }
 0x186   : > { %v250_v28 = vsel %vm236_vm2, %v249_v27, 0.0 }
 0x187   : > { %251 = vadd.xlane.f32.xlu1 %v250_v28 }
 0x1fa   : > { %v252_v29 = vpop.xlane.xlu1 %251 }
 0x1fb   : > { %v253_v30 = vmul.f32 %v252_v29, %v246_v23 }
 0x1fd   : > { %v254_v31 = vadd.f32 1e-05, %v253_v30 }
 0x1ff   : > { %409 = vrsqrt.f32 %v254_v31  ;;  %vm261_vm5 = vweird.f32 %v254_v31 }
 0x205   : > { %v410_v32 = vpop.eup %409 }
 0x206   : > { %v256_v33 = vmul.f32 %v410_v32, %v254_v31  ;;  %vm262_vm4 = vweird.f32 %v410_v32 }
 0x207   : > { %vm263_vm6 = vmor %vm261_vm5, %vm262_vm4 }
 0x208   : > { %v257_v34 = vmul.f32 %v410_v32, %v256_v33 }
 0x20a   : > { %v258_v35 = vmul.f32 0.5, %v257_v34 }
 0x20c   : > { %v259_v36 = vsub.f32 1.5, %v258_v35 }
 0x20e   : > { %v260_v37 = vmul.f32 %v410_v32, %v259_v36 }
 0x210   : > { %v264_v39 = vsel %vm263_vm6, %v410_v32, %v260_v37 }
 0x211   : > { %v265_v40 = vmul.f32 %v264_v39, %v248_v26 }
 0x213   : > { %v269_v42 = vmul.f32 %v405_v38, %v265_v40 }
 0x215   : > { %v273_v43 = vadd.f32 %v406_v41, %v269_v42 }
 0x217   : > { %274 = vst.msk [vmem:[%s188_s20] sm:$0xff] %vm236_vm2, %v273_v43 }
 0x218   : > { %438 = shalt.err (!%p435_p3)
}
 0x219   : > { %362 = dma.vmem_to_hbm [thread:$0]  (%p541_p5), %s289_s19, 128, %s291_s22, %s276_s23  }
 0x21a PF: > { %p368_p4 = scmp.ge.s32.totalorder %s473_s18, 2  ;;  %s302_s5 = sand.u32 1, %s461_s15  }
 0x21b   : > { %s303_s9 = scalar_lea.sflag [#allocation3], %s302_s5 }
 0x21c   : > { %p365_p7 = pnand %p368_p4, %p545_p6 }
 0x21e   : > { %p366_p8 = pneg %p365_p7 }
 0x220   : > { %456 = dma.done.wait (%p366_p8), %s303_s9, 128  }
 0x221   : > { %458 = vsyncadd (%p366_p8), %s303_s9, 4294967168  ;;  %p14_p9 = scmp.ge.s32.totalorder %s528_s21, 4   ;;  %s628_s15 = smov %s465_s16 }
 0x222   : > { %s629_s16 = smov %s469_s17  ;;  %s630_s17 = smov %s539_s24 }
 0x223   : > { %s631_s18 = smov %s528_s21  ;;  %16 = sbr.rel (!%p14_p9) target bundleno = 3 (0x3), region = 71 }
 0x228   :  { %309 = vsyncpa [#allocation3], 1 }
 0x229   :  { %311 = vsyncpa [#allocation3 + $0x1], 1 }

</bundles_post_ra>
